<compile_context>
chip_gen: v7x
topology: tpu7x:2x2x1
jax: 0.10.0
libtpu: 0.0.40
codegen_flags: <defaults>
</compile_context>

<pallas_src>
import functools

import jax
import jax.numpy as jnp
from jax.experimental import pallas as pl
from jax.experimental.pallas import tpu as pltpu


# Packed-parameter slab layout (f32, shape (32, 128)):
#   rows  0..9 , cols 0..4   : W1  (stored [in, out], i.e. transposed vs torch)
#   row   10   , cols 0..4   : b1
#   rows 16..20, cols 0..127 : W2 zero-padded to 128 output columns (cols 0..1 real)
#   row   21   , cols 0..127 : b2 zero-padded to 128 columns
_P_ROWS, _P_COLS = 32, 128
_IN, _HID, _OUT = 10, 5, 2
_W2_ROW = 16


def mlp_kernel(x_ref, p_ref, out_ref):
    # Hot path: two MXU matmuls + bias + ReLU, entirely on the current VMEM tiles.
    x = x_ref[...]                                     # (TB, 10) f32
    p = p_ref[...]                                     # (32, 128) f32, VMEM-resident
    w1 = p[:_IN, :_HID]                                # (10, 5)
    b1 = p[_IN:_IN + 1, :_HID]                         # (1, 5)
    w2 = p[_W2_ROW:_W2_ROW + _HID, :]                  # (5, 128), cols >= 2 are zero
    b2 = p[_W2_ROW + _HID:_W2_ROW + _HID + 1, :]       # (1, 128), cols >= 2 are zero

    h = jnp.dot(x, w1, preferred_element_type=jnp.float32) + b1    # (TB, 5)
    h = jnp.maximum(h, 0.0)                                        # ReLU
    # Padded second layer -> lane-dense (TB, 128) output tile; cols 2..127 are zero.
    y = jnp.dot(h, w2, preferred_element_type=jnp.float32) + b2    # (TB, 128)
    out_ref[...] = y


def pack_params(w1, b1, w2, b2):
    """Pack Linear(10,5)+Linear(5,2) params into one (32,128) f32 slab (do once)."""
    p = jnp.zeros((_P_ROWS, _P_COLS), jnp.float32)
    p = p.at[:_IN, :_HID].set(w1.astype(jnp.float32))
    p = p.at[_IN, :_HID].set(b1.reshape(_HID).astype(jnp.float32))
    p = p.at[_W2_ROW:_W2_ROW + _HID, :_OUT].set(w2.astype(jnp.float32))
    p = p.at[_W2_ROW + _HID, :_OUT].set(b2.reshape(_OUT).astype(jnp.float32))
    return p


@functools.partial(jax.jit, static_argnames=("tb",))
def neural_network_forward(x, packed_params, *, tb=2048):
    """x: (B, 10) f32, packed_params: (32, 128) f32 from pack_params. Returns (B, 2) f32."""
    B = x.shape[0]
    # Batch tile: multiple of 8 sublanes, capped at `tb` rows.
    TB = min(tb, max(8, ((B + 7) // 8) * 8))
    n_blocks = pl.cdiv(B, TB)
    Bp = n_blocks * TB
    xp = x if Bp == B else jnp.pad(x, ((0, Bp - B), (0, 0)))

    # VMEM budget: double-buffered x + out tiles, resident params, plus headroom.
    tile_bytes = TB * _IN * 4 + TB * _P_COLS * 4
    vmem_limit = min(int(2 * tile_bytes + _P_ROWS * _P_COLS * 4 + (4 << 20)), 32 << 20)

    out_padded = pl.pallas_call(
        mlp_kernel,
        out_shape=jax.ShapeDtypeStruct((Bp, _P_COLS), jnp.float32),
        grid_spec=pltpu.PrefetchScalarGridSpec(
            num_scalar_prefetch=0,
            grid=(n_blocks,),
            in_specs=[
                pl.BlockSpec((TB, _IN), lambda i: (i, 0)),           # x: tiled over batch
                pl.BlockSpec((_P_ROWS, _P_COLS), lambda i: (0, 0)),  # params: resident
            ],
            out_specs=pl.BlockSpec((TB, _P_COLS), lambda i: (i, 0)),  # lane-dense output
        ),
        compiler_params=pltpu.CompilerParams(
            dimension_semantics=("parallel",),       # shard batch across TCs on v7x
            vmem_limit_bytes=vmem_limit,
        ),
        cost_estimate=pl.CostEstimate(
            flops=2 * B * (_IN * _HID + _HID * _OUT),
            transcendentals=0,
            bytes_accessed=B * (_IN + _P_COLS) * 4 + _P_ROWS * _P_COLS * 4,
        ),
    )(xp, packed_params)
    return out_padded[:B, :_OUT]


def init_params(key):
    """Deterministic synthetic parameters matching nn.Linear(10,5), nn.Linear(5,2)."""
    k1, k2, k3, k4 = jax.random.split(key, 4)
    # PyTorch nn.Linear default init: U(-1/sqrt(fan_in), 1/sqrt(fan_in))
    lim1 = 1.0 / jnp.sqrt(10.0)
    lim2 = 1.0 / jnp.sqrt(5.0)
    w1 = jax.random.uniform(k1, (10, 5), jnp.float32, -lim1, lim1)   # stored (in, out)
    b1 = jax.random.uniform(k2, (5,), jnp.float32, -lim1, lim1)
    w2 = jax.random.uniform(k3, (5, 2), jnp.float32, -lim2, lim2)
    b2 = jax.random.uniform(k4, (2,), jnp.float32, -lim2, lim2)
    return w1, b1, w2, b2


if __name__ == "__main__":
    key = jax.random.PRNGKey(0)
    kx, kp = jax.random.split(key)
    batch = 8
    x = jax.random.normal(kx, (batch, 10), jnp.float32)
    w1, b1, w2, b2 = init_params(kp)

    packed = pack_params(w1, b1, w2, b2)
    out = neural_network_forward(x, packed)
    out = jax.block_until_ready(out)

    # Pure-JAX reference check of the same math.
    ref = jnp.maximum(x @ w1 + b1, 0.0) @ w2 + b2
    assert out.shape == (batch, 2)
    assert jnp.allclose(out, ref, atol=1e-5, rtol=1e-5)

    print("KERNEL_OK")
</pallas_src>

<mosaic_0001>
module attributes {stable_mosaic.version = 11 : i64} {
  func.func @mlp_kernel(%arg0: i32, %arg1: memref<8x10xf32, #tpu.memory_space<vmem>>, %arg2: memref<32x128xf32, #tpu.memory_space<vmem>>, %arg3: memref<8x128xf32, #tpu.memory_space<vmem>>) attributes {dimension_semantics = [#tpu.dimension_semantics<parallel>], iteration_bounds = array<i64: 1>, scalar_prefetch = 0 : i64, scratch_operands = 0 : i64, tpu.core_type = #tpu.core_type<tc>, window_params = [{transform_indices = @transform_0, window_bounds = array<i64: 8, 10>}, {pipeline_mode = #tpu.pipeline_mode<synchronous>, transform_indices = @transform_1, window_bounds = array<i64: 32, 128>}, {transform_indices = @transform_2, window_bounds = array<i64: 8, 128>}]} {
    %c0 = arith.constant 0 : index
    %c0_0 = arith.constant 0 : index
    %0 = vector.load %arg1[%c0, %c0_0] : memref<8x10xf32, #tpu.memory_space<vmem>>, vector<8x10xf32>
    %c0_1 = arith.constant 0 : index
    %c0_2 = arith.constant 0 : index
    %1 = vector.load %arg2[%c0_1, %c0_2] : memref<32x128xf32, #tpu.memory_space<vmem>>, vector<32x128xf32>
    %2 = vector.extract_strided_slice %1 {offsets = [0, 0], sizes = [10, 5], strides = [1, 1]} : vector<32x128xf32> to vector<10x5xf32>
    %3 = vector.extract_strided_slice %1 {offsets = [10, 0], sizes = [1, 5], strides = [1, 1]} : vector<32x128xf32> to vector<1x5xf32>
    %4 = vector.extract_strided_slice %1 {offsets = [16, 0], sizes = [5, 128], strides = [1, 1]} : vector<32x128xf32> to vector<5x128xf32>
    %5 = vector.extract_strided_slice %1 {offsets = [21, 0], sizes = [1, 128], strides = [1, 1]} : vector<32x128xf32> to vector<1x128xf32>
    %cst = arith.constant dense<0.000000e+00> : vector<8x5xf32>
    %6 = tpu.matmul %0, %2, %cst {dimension_numbers = #tpu.dot_dimension_numbers<[1], [0], [0], [1], [0, 0, 1, 1], [], []>} : vector<8x10xf32>, vector<10x5xf32>, vector<8x5xf32> -> vector<8x5xf32>
    %7 = vector.broadcast %3 : vector<1x5xf32> to vector<8x5xf32>
    %8 = arith.addf %6, %7 : vector<8x5xf32>
    %cst_3 = arith.constant 0.000000e+00 : f32
    %9 = vector.broadcast %cst_3 : f32 to vector<8x5xf32>
    %10 = arith.maximumf %8, %9 : vector<8x5xf32>
    %cst_4 = arith.constant dense<0.000000e+00> : vector<8x128xf32>
    %11 = tpu.matmul %10, %4, %cst_4 {dimension_numbers = #tpu.dot_dimension_numbers<[1], [0], [0], [1], [0, 0, 1, 1], [], []>} : vector<8x5xf32>, vector<5x128xf32>, vector<8x128xf32> -> vector<8x128xf32>
    %12 = vector.broadcast %5 : vector<1x128xf32> to vector<8x128xf32>
    %13 = arith.addf %11, %12 : vector<8x128xf32>
    %c0_5 = arith.constant 0 : index
    %c0_6 = arith.constant 0 : index
    %14 = vector.load %arg3[%c0_5, %c0_6] : memref<8x128xf32, #tpu.memory_space<vmem>>, vector<8x128xf32>
    tpu.vector_store %arg3[%c0_5, %c0_6], %13 {strides = array<i32>} : memref<8x128xf32, #tpu.memory_space<vmem>>, vector<8x128xf32>,
    return
  }
  func.func @transform_0(%arg0: i32) -> (i32, i32) {
    %c0_i32 = arith.constant 0 : i32
    %c0_i32_0 = arith.constant 0 : i32
    return %arg0, %c0_i32 : i32, i32
  }
  func.func @transform_1(%arg0: i32) -> (i32, i32) {
    %c0_i32 = arith.constant 0 : i32
    %c0_i32_0 = arith.constant 0 : i32
    %c0_i32_1 = arith.constant 0 : i32
    return %c0_i32, %c0_i32_0 : i32, i32
  }
  func.func @transform_2(%arg0: i32) -> (i32, i32) {
    %c0_i32 = arith.constant 0 : i32
    %c0_i32_0 = arith.constant 0 : i32
    return %arg0, %c0_i32 : i32, i32
  }
}

</mosaic_0001>

<bundles_post_ra>
// kernel: neural_network_forward.1
= control target key start
LH: loop header
LB: loop body
LE: loop exit
PB: predicated region body
PF: predicated region fallthrough
CT: control target
= control target key end

     0   :  { %7 = vsyncpa [#allocation3], 0  ;;  %s351_s0 = inlined_call_operand.hbm [shape: f32[8,10], index: 0, kind: input, shape index: {}]   ;;  %s352_s1 = inlined_call_operand.hbm [shape: f32[32,128], index: 1, kind: input, shape index: {}]   ;;  %s353_s2 = inlined_call_operand.vmem [shape: f32[8,128], index: 2, kind: output, shape index: {}]  }
   0x1   :  { %8 = vsyncpa [#allocation5], 0  ;;  %s294_s9 = smov [#allocation2]   ;;  %s295_s11 = smov [#allocation4]  }
   0x2   :  { %s15_s10 = sshll.u32 %s294_s9, 4  ;;  %s24_s12 = sshll.u32 %s295_s11, 4  ;;  %s16_s10 = int_to_ptr.vmem [resolvable:$true] %s15_s10  ;;  %s317_s12 = int_to_ptr.vmem [resolvable:$true] %s24_s12 }
   0x3   :  { %s246_s15 = scalar_lea.hbm %s351_s0, 128 }
   0x4   :  { %p247_p0 = scmp.ne.s32.totalorder %s351_s0, %s246_s15  ;;  %p250_p1 = scmp.lt.u32.totalorder %s246_s15, %s351_s0 }
   0x6   :  { %p252_p2 = pnand %p250_p1, %p247_p0 }
   0x8   :  { %255 = shalt.err (!%p252_p2)
}
   0x9   :  { %s256_s20 = scalar_lea.vmem %s16_s10, 128  ;;  %p261_p4 = scmp.lt.s32.totalorder %s16_s10, %s16_s10 }
   0xa   :  { %p257_p3 = scmp.ne.s32.totalorder %s16_s10, %s256_s20  ;;  %p262_p5 = scmp.lt.s32.totalorder %s256_s20, %s256_s20 }
   0xc   :  { %p263_p6 = por %p262_p5, %p261_p4 }
   0xe   :  { %p264_p7 = pnand %p263_p6, %p257_p3 }
  0x10   :  { %267 = shalt.err (!%p264_p7)
}
  0x11   :  { %18 = dma.hbm_to_vmem [thread:$0]  %s351_s0, 128, %s16_s10, [#allocation3]  }
  0x12   :  { %s268_s25 = scalar_lea.hbm %s352_s1, 512 }
  0x13   :  { %p269_p8 = scmp.ne.s32.totalorder %s352_s1, %s268_s25  ;;  %p272_p9 = scmp.lt.u32.totalorder %s268_s25, %s352_s1 }
  0x15   :  { %p274_p10 = pnand %p272_p9, %p269_p8 }
  0x17   :  { %277 = shalt.err (!%p274_p10)
}
  0x18   :  { %s278_s30 = scalar_lea.vmem %s317_s12, 512  ;;  %p283_p12 = scmp.lt.s32.totalorder %s317_s12, %s317_s12 }
  0x19   :  { %p279_p11 = scmp.ne.s32.totalorder %s317_s12, %s278_s30  ;;  %p284_p13 = scmp.lt.s32.totalorder %s278_s30, %s278_s30 }
  0x1b   :  { %p285_p0 = por %p284_p13, %p283_p12 }
  0x1d   :  { %p286_p1 = pnand %p285_p0, %p279_p11 }
  0x1f   :  { %289 = shalt.err (!%p286_p1)
}
  0x20   :  { %s296_s0 = smov 128   ;;  %s297_s3 = smov 8  }
  0x21   :  { %30 = dma.hbm_to_vmem [thread:$0]  %s352_s1, 512, %s317_s12, [#allocation5], %s296_s0, %s296_s0, %s297_s3  }
  0x22   :  { %290 = dma.done.wait [#allocation3], 128  }
  0x23   :  { %291 = vsyncadd [#allocation3], 4294967168 }
  0x24   :  { %292 = dma.done.wait [#allocation5], 512  }
  0x25   :  { %293 = vsyncadd [#allocation5], 4294966784  ;;  %v298_v0 = vmov 0.0|0.0   ;;  %vm299_vm0 = vmmov 0   ;;  %v300_v1 = vmov 0.0   ;;  %vm49_vm1 = vcmask 1041408  }
  0x26   :  { %234 = vmatprep.subr.bf16.mxu0 %v298_v0  ;;  %226 = vmatprep.mubr.msk.f32.mxu0 %vm299_vm0, %v300_v1  ;;  %v38_v2 = vld [vmem:[#allocation4] sm:$0xff]  ;;  %v39_v3 = vld [vmem:[#allocation4 + $0x8] sm:$0xff]  ;;  %vm301_vm2 = vmmov 1   ;;  %v37_v5 = vld [vmem:[#allocation2] sm:$0xff]  ;;  %vm45_vm4 = vcmask 80896   ;;  %vm132_vm5 = vcmask 1044480   ;;  %v41_v7 = vlaneseq }
  0x27   :  { %229 = vmatprep.subr.mxu1 %v300_v1  ;;  %231 = vmatprep.mubr.msk.f32.mxu1 %vm299_vm0, %v300_v1  ;;  %vm236_vm3 = vmpackc.low %vm49_vm1, %vm301_vm2  ;;  %v235_v4 = vpack.c.bf16 %v39_v3, %v38_v2  ;;  %v40_v6 = vld [vmem:[#allocation4 + $0x10] sm:$0xff]  ;;  %vm128_vm6 = vcmask 39936  }
  0x28   :  { %230 = vmatpush3.msk.msra.mxu1 %vm132_vm5, %v40_v6  ;;  %v42_v8 = vshrl.u32 %v41_v7, 7 }
  0x29   :  { %237 = vmatpush3.bf16.msk.msra.mxu0 %vm236_vm3, %v235_v4 }
  0x2a   :  { %v43_v9 = vsub.s32 2, %v42_v8  ;;  %v126_v15 = vsub.s32 5, %v42_v8 }
  0x2c   :  { %227 = vmatmul.mubr.msk.f32.vlgmr.msra.gmra.mrb[0].mxu0 %vm45_vm4, %v37_v5  ;;  %v44_v10 = vrot.slane %v39_v3, %v43_v9  ;;  %v127_v16 = vrot.slane %v40_v6, %v126_v15 }
  0xff   :  { %v119_v11 = vpop.f32.mrb[0].mxu0 }
 0x100   :  { %v120_v12 = vadd.f32 %v119_v11, %v44_v10  ;;  %v228_v13 = vpop.f32.mrb[1].mxu0 }
 0x102   :  { %v123_v14 = vmax.f32 %v120_v12, 0.0 }
 0x104   :  { %232 = vmatmul.mubr.msk.f32.vlgmr.msra.gmra.mrb[0].mxu1 %vm128_vm6, %v123_v14 }
 0x1d7   :  { %v202_v17 = vpop.f32.mrb[0].mxu1 }
 0x1d8   :  { %v203_v18 = vadd.f32 %v202_v17, %v127_v16  ;;  %v233_v19 = vpop.f32.mrb[1].mxu1 }
 0x1da   :  { %206 = vst [vmem:[%s353_s2] sm:$0xff] %v203_v18 }
 0x1db   :  { %211 = vsyncpa [#allocation3], 1 }
 0x1dc   :  { %212 = vsyncpa [#allocation5], 1 }

</bundles_post_ra>
